<compile_context>
chip_gen: v5e
topology: v5e:2x2
jax: 0.10.0
libtpu: 0.0.40
codegen_flags: <defaults>
</compile_context>

<pallas_src>
import functools

import numpy as np
import jax
import jax.numpy as jnp
from jax.experimental import pallas as pl
from jax.experimental.pallas import tpu as pltpu


# ----------------------------------------------------------------------------
# Pallas kernel
# ----------------------------------------------------------------------------
def _w2v2_loss_kernel(t_ref, lab_hbm_ref, sel_ref, perp_ref,      # inputs
                      loss_ref, closs_ref, dloss_ref,             # outputs
                      acc_ref, labn_ref, lab_sem,                 # scratch
                      *, inv_k, alpha, inv_gv, inv_n, bf16_exp):
    i = pl.program_id(0)
    n_tile = t_ref.shape[0]
    eps2 = 1e-16   # (1e-8)^2 — matches torch CosineSimilarity eps for nonzero rows

    # ---- init (grid step 0): zero accumulator; fetch labels from HBM ONCE and
    #      L2-normalize them in place into the single bf16 VMEM scratch.
    @pl.when(i == 0)
    def _init():
        acc_ref[...] = jnp.zeros_like(acc_ref)
        cp = pltpu.make_async_copy(lab_hbm_ref, labn_ref, lab_sem)
        cp.start()
        cp.wait()
        lab = labn_ref[...].astype(jnp.float32)                       # (N_pad, D)
        l_sq = jnp.sum(lab * lab, axis=-1, keepdims=True)             # (N_pad, 1)
        labn_ref[...] = (lab * jax.lax.rsqrt(jnp.maximum(l_sq, eps2))
                         ).astype(labn_ref.dtype)                     # unit rows, bf16

    # ---- per-tile work -------------------------------------------------------
    t = t_ref[...].astype(jnp.float32)                                # (N_TILE, D)
    t_sq = jnp.sum(t * t, axis=-1, keepdims=True)                     # (N_TILE, 1)
    tn = t * jax.lax.rsqrt(jnp.maximum(t_sq, eps2))

    # Positive-pair cosine: D-wide row dot against the matching label tile
    # (replaces the iota/where diagonal extraction + N_pad-wide reduce).
    row0 = pl.multiple_of(i * n_tile, n_tile)
    lab_tile = labn_ref[pl.ds(row0, n_tile), :].astype(jnp.float32)   # (N_TILE, D)
    cos_pos = jnp.sum(tn * lab_tile, axis=-1, keepdims=True)          # (N_TILE, 1)

    # All cosines of this target tile vs. every label row: one bf16 MXU pass.
    cos_all = jax.lax.dot_general(
        tn.astype(jnp.bfloat16), labn_ref[...],
        dimension_numbers=(((1,), (1,)), ((), ())),
        preferred_element_type=jnp.float32)                           # (N_TILE, N_pad)

    # Denominator: sum over {positive, K negatives} selected by the int8 mask
    # (padded rows select only themselves -> their term is exactly 0).
    scaled = cos_all * inv_k
    if bf16_exp:                                                      # v6e/v7x only
        exp_all = jnp.exp(scaled.astype(jnp.bfloat16)).astype(jnp.float32)
    else:
        exp_all = jnp.exp(scaled)
    neg_sim = jnp.sum(exp_all * sel_ref[...].astype(jnp.float32),
                      axis=-1, keepdims=True)                         # (N_TILE, 1)

    # log(exp(cos_pos/k) / neg_sim) == cos_pos/k - log(neg_sim)
    per_row = cos_pos * inv_k - jnp.log(neg_sim)                      # (N_TILE, 1)
    acc_ref[...] += jnp.sum(per_row, keepdims=True)                   # (1, 1)

    # ---- finalize: contrastive mean + diversity term (computed once) --------
    @pl.when(i == pl.num_programs(0) - 1)
    def _fin():
        contrastive = -acc_ref[...] * inv_n                           # (1, 1)
        p = perp_ref[...].astype(jnp.float32)
        diversity = jnp.sum(p * jnp.log(jnp.maximum(p, 1e-30)),
                            keepdims=True) * inv_gv                   # (1, 1)
        loss_ref[...] = contrastive + alpha * diversity
        closs_ref[...] = contrastive
        dloss_ref[...] = diversity


def _pallas_losses(targets, labels_bf16, sel_i8, perplexity, *,
                   inv_k, alpha, inv_gv, inv_n, n_tile,
                   bf16_exp=False, vmem_limit_bytes=None):
    n_pad, d = targets.shape
    g, v = perplexity.shape
    assert n_pad % n_tile == 0
    n_steps = n_pad // n_tile

    if vmem_limit_bytes is None:
        # single bf16 label copy + double-buffered targets/sel tiles + margin
        need = (n_pad * d * 2
                + 2 * n_tile * d * targets.dtype.itemsize
                + 2 * n_tile * n_pad * 1
                + 2 * g * v * 4 + (1 << 16))
        vmem_limit_bytes = int(min(max(need + (4 << 20), 16 << 20), 64 << 20))

    kernel = functools.partial(_w2v2_loss_kernel, inv_k=inv_k, alpha=alpha,
                               inv_gv=inv_gv, inv_n=inv_n, bf16_exp=bf16_exp)

    scalar = jax.ShapeDtypeStruct((1, 1), jnp.float32)
    loss, closs, dloss = pl.pallas_call(
        kernel,
        out_shape=(scalar, scalar, scalar),
        grid_spec=pltpu.PrefetchScalarGridSpec(
            num_scalar_prefetch=0,
            grid=(n_steps,),
            in_specs=[
                pl.BlockSpec((n_tile, d), lambda i: (i, 0)),       # targets tile
                pl.BlockSpec(memory_space=pl.ANY),                 # labels: stay in HBM
                pl.BlockSpec((n_tile, n_pad), lambda i: (i, 0)),   # int8 selection tile
                pl.BlockSpec((g, v), lambda i: (0, 0)),            # perplexity (resident)
            ],
            out_specs=[
                pl.BlockSpec((1, 1), lambda i: (0, 0)),
                pl.BlockSpec((1, 1), lambda i: (0, 0)),
                pl.BlockSpec((1, 1), lambda i: (0, 0)),
            ],
            scratch_shapes=[
                pltpu.VMEM((1, 1), jnp.float32),        # loss accumulator
                pltpu.VMEM((n_pad, d), jnp.bfloat16),   # normalized labels (single copy)
                pltpu.SemaphoreType.DMA(()),            # label DMA completion
            ],
        ),
        compiler_params=pltpu.CompilerParams(
            dimension_semantics=("arbitrary",),         # serial accumulation axis
            vmem_limit_bytes=vmem_limit_bytes),
    )(targets, labels_bf16, sel_i8, perplexity)
    return loss[0, 0], closs[0, 0], dloss[0, 0]


# ----------------------------------------------------------------------------
# Host-side index setup (data-dependent shapes / RNG — as in the torch module)
# ----------------------------------------------------------------------------
def _round_up(x, m):
    return ((x + m - 1) // m) * m


def _negative_sample_indices(num_targets_per_batch, K, seed=0):
    """Vectorized equivalent of ContrastiveLoss.negative_sampler's indices:
    per target row, K distinct negatives drawn uniformly from the other rows
    of the same batch entry (global row indices, shape (N, K))."""
    rng = np.random.default_rng(seed)
    chunks = []
    start = 0
    for n in num_targets_per_batch:
        assert n - 1 >= K, "need at least K other masked frames per batch entry"
        picks = np.argsort(rng.random((n, n - 1)), axis=1)[:, :K]   # in [0, n-1)
        self_idx = np.arange(n)[:, None]
        neg = picks + (picks >= self_idx)                           # skip self
        chunks.append(neg + start)
        start += n
    return np.concatenate(chunks, axis=0).astype(np.int32)          # (N, K)


def wav2vec2_loss(encoder_out, quantized_features, perplexity, time_mask_indices,
                  *, k, K, a, G, V, sample_seed=0, n_tile=256,
                  bf16_exp=False, vmem_limit_bytes=None):
    # TODO(synk): boolean-mask gather + negative sampling have data-dependent
    # shapes / host RNG (as in the PyTorch module) and stay host-side.
    mask_np = np.asarray(time_mask_indices)
    b_idx, t_idx = np.nonzero(mask_np)                 # row-major == torch bool-index
    n_total = int(b_idx.shape[0])
    assert n_total > 0
    targets = encoder_out[b_idx, t_idx]                # (N, D) device gather
    labels = quantized_features[b_idx, t_idx]          # (N, D)
    num_per_batch = mask_np.sum(axis=1).astype(int).tolist()

    neg_idx = _negative_sample_indices(num_per_batch, K, seed=sample_seed)   # (N, K)

    # Tile size over N: multiple of 32 so the int8 sel tile is sublane-aligned;
    # pad N so the grid divides evenly.  Padded rows select only themselves.
    n_tile = max(32, min(_round_up(int(n_tile), 32), _round_up(n_total, 32)))
    n_pad = _round_up(n_total, n_tile)
    pad = n_pad - n_total

    targets_p = jnp.pad(targets, ((0, pad), (0, 0))) if pad else targets
    labels_bf16 = labels.astype(jnp.bfloat16)          # halve label HBM + VMEM bytes
    labels_p = jnp.pad(labels_bf16, ((0, pad), (0, 0))) if pad else labels_bf16

    # int8 (N_pad, N_pad) 0/1 selection matrix built ON DEVICE from the small
    # (N, K) neg_idx: row n selects the positive (itself, as in torch's
    # concat([labels.unsqueeze(1), negatives])) plus its K sampled negatives.
    # TODO(synk): sel is block-diagonal per batch entry; a (batch, tile) grid
    # with scalar-prefetched per-batch offsets would cut FLOPs/exp/DMA ~Bx.
    diag = jnp.arange(n_pad)
    sel = jnp.zeros((n_pad, n_pad), jnp.int8).at[diag, diag].set(1)
    sel = sel.at[jnp.repeat(jnp.arange(n_total), K),
                 jnp.asarray(neg_idx.reshape(-1))].set(1)

    loss, closs, dloss = _pallas_losses(
        targets_p, labels_p, sel, perplexity,
        inv_k=1.0 / float(k), alpha=float(a), inv_gv=1.0 / float(G * V),
        inv_n=1.0 / float(n_total), n_tile=n_tile,
        bf16_exp=bf16_exp, vmem_limit_bytes=vmem_limit_bytes)
    return loss, closs, dloss, (targets, labels, neg_idx)


# ----------------------------------------------------------------------------
# Pure-numpy reference (mirrors the PyTorch math exactly)
# ----------------------------------------------------------------------------
def _ref_losses(targets, labels, neg_idx, perplexity, k, a, GV):
    t = np.asarray(targets, np.float64)
    l = np.asarray(labels, np.float64)
    eps = 1e-8
    neg = np.concatenate([l[:, None, :], l[np.asarray(neg_idx)]], axis=1)  # (N,K+1,D)
    tn = np.linalg.norm(t, axis=-1, keepdims=True)
    ln = np.linalg.norm(l, axis=-1, keepdims=True)
    cos_pos = (t * l).sum(-1, keepdims=True) / np.maximum(tn * ln, eps)
    nn = np.linalg.norm(neg, axis=-1)
    cos_neg = (t[:, None, :] * neg).sum(-1) / np.maximum(tn * nn, eps)
    neg_sim = np.exp(cos_neg / k).sum(-1, keepdims=True)
    closs = float(-np.log(np.exp(cos_pos / k) / neg_sim).mean())
    p = np.asarray(perplexity, np.float64)
    dloss = float((p * np.log(p)).sum() / GV)
    return closs + a * dloss, closs, dloss


# ----------------------------------------------------------------------------
if __name__ == "__main__":
    # Small config (mirrors the module's __init__ attributes).
    B, T, D = 2, 64, 64
    K_NEG = 8            # num_contrastive_loss_negative_samples
    TEMP = 0.1           # contrastive_loss_temperature
    G, V = 2, 4          # num_code_vector_groups, num_code_vectors_per_group
    ALPHA = 0.1          # loss_alpha

    key = jax.random.PRNGKey(0)
    k1, k2, k3, k4 = jax.random.split(key, 4)

    encoder_out = jax.random.normal(k1, (B, T, D), dtype=jnp.float32)
    quantized_features = jax.random.normal(k2, (B, T, D), dtype=jnp.float32)
    perplexity = jax.nn.softmax(jax.random.normal(k3, (G, V), dtype=jnp.float32), axis=-1)

    # deterministic time mask: 48 masked frames per batch row (N = 96 targets)
    mask = np.zeros((B, T), dtype=bool)
    perm_keys = jax.random.split(k4, B)
    for b in range(B):
        pos = np.asarray(jax.random.permutation(perm_keys[b], T))[:48]
        mask[b, np.sort(pos)] = True

    loss, closs, dloss, (tg, lb, neg_idx) = wav2vec2_loss(
        encoder_out, quantized_features, perplexity, mask,
        k=TEMP, K=K_NEG, a=ALPHA, G=G, V=V, sample_seed=0,
        n_tile=32)  # N=96 -> 3 grid steps (exercises accumulation + pl.ds offsets)
    loss, closs, dloss = jax.block_until_ready((loss, closs, dloss))

    ref_loss, ref_closs, ref_dloss = _ref_losses(
        np.asarray(tg), np.asarray(lb), neg_idx, np.asarray(perplexity),
        TEMP, ALPHA, G * V)

    assert np.isfinite(float(loss)), float(loss)
    # bf16 MXU operands + small temperature (exp of cos*10) -> ~1e-2-level rounding
    assert np.allclose(float(closs), ref_closs, rtol=5e-2, atol=1e-2), (float(closs), ref_closs)
    assert np.allclose(float(dloss), ref_dloss, rtol=1e-3, atol=1e-5), (float(dloss), ref_dloss)
    assert np.allclose(float(loss), ref_loss, rtol=5e-2, atol=1e-2), (float(loss), ref_loss)

    print("KERNEL_OK")
</pallas_src>

<mosaic_0001>
module attributes {stable_mosaic.version = 11 : i64} {
  func.func @_w2v2_loss_kernel(%arg0: i32, %arg1: memref<32x64xf32, #tpu.memory_space<vmem>>, %arg2: memref<96x64xbf16, #tpu.memory_space<any>>, %arg3: memref<32x96xi8, #tpu.memory_space<vmem>>, %arg4: memref<2x4xf32, #tpu.memory_space<vmem>>, %arg5: memref<1x1xf32, #tpu.memory_space<vmem>>, %arg6: memref<1x1xf32, #tpu.memory_space<vmem>>, %arg7: memref<1x1xf32, #tpu.memory_space<vmem>>, %arg8: memref<1x1xf32, #tpu.memory_space<vmem>>, %arg9: memref<96x64xbf16, #tpu.memory_space<vmem>>, %arg10: memref<!tpu.dma_semaphore, #tpu.memory_space<semaphore_mem>>) attributes {dimension_semantics = [#tpu.dimension_semantics<arbitrary>], iteration_bounds = array<i64: 3>, scalar_prefetch = 0 : i64, scratch_operands = 3 : i64, tpu.core_type = #tpu.core_type<tc>, window_params = [{transform_indices = @transform_0, window_bounds = array<i64: 32, 64>}, {}, {transform_indices = @transform_2, window_bounds = array<i64: 32, 96>}, {pipeline_mode = #tpu.pipeline_mode<synchronous>, transform_indices = @transform_3, window_bounds = array<i64: 2, 4>}, {pipeline_mode = #tpu.pipeline_mode<synchronous>, transform_indices = @transform_4, window_bounds = array<i64: 1, 1>}, {pipeline_mode = #tpu.pipeline_mode<synchronous>, transform_indices = @transform_5, window_bounds = array<i64: 1, 1>}, {pipeline_mode = #tpu.pipeline_mode<synchronous>, transform_indices = @transform_6, window_bounds = array<i64: 1, 1>}]} {
    %c0_i32 = arith.constant 0 : i32
    %0 = arith.cmpi eq, %arg0, %c0_i32 : i32
    %1 = arith.extui %0 : i1 to i32
    %c0_i32_0 = arith.constant 0 : i32
    %2 = arith.cmpi ne, %1, %c0_i32_0 : i32
    scf.if %2 {
      %cst_19 = arith.constant 0.000000e+00 : f32
      %46 = vector.broadcast %cst_19 : f32 to vector<1x1xf32>
      %c0_20 = arith.constant 0 : index
      %c0_21 = arith.constant 0 : index
      %47 = vector.load %arg8[%c0_20, %c0_21] : memref<1x1xf32, #tpu.memory_space<vmem>>, vector<1x1xf32>
      tpu.vector_store %arg8[%c0_20, %c0_21], %46 {strides = array<i32>} : memref<1x1xf32, #tpu.memory_space<vmem>>, vector<1x1xf32>,
      tpu.enqueue_dma source(%arg2 : memref<96x64xbf16, #tpu.memory_space<any>>) target(%arg9 : memref<96x64xbf16, #tpu.memory_space<vmem>>) target_semaphore(%arg10 : memref<!tpu.dma_semaphore, #tpu.memory_space<semaphore_mem>>)
      tpu.wait_dma2 semaphore(%arg10 : memref<!tpu.dma_semaphore, #tpu.memory_space<semaphore_mem>>) src(%arg2 : memref<96x64xbf16, #tpu.memory_space<any>>) dst(%arg9 : memref<96x64xbf16, #tpu.memory_space<vmem>>)
      %c0_22 = arith.constant 0 : index
      %c0_23 = arith.constant 0 : index
      %48 = vector.load %arg9[%c0_22, %c0_23] : memref<96x64xbf16, #tpu.memory_space<vmem>>, vector<96x64xbf16>
      %49 = arith.extf %48 : vector<96x64xbf16> to vector<96x64xf32>
      %50 = arith.mulf %49, %49 : vector<96x64xf32>
      %cst_24 = arith.constant dense<0.000000e+00> : vector<96xf32>
      %51 = vector.multi_reduction <add>, %50, %cst_24 [1] : vector<96x64xf32> to vector<96xf32>
      %52 = vector.shape_cast %51 : vector<96xf32> to vector<96x1xf32>
      %cst_25 = arith.constant 1.000000e-16 : f32
      %53 = vector.broadcast %cst_25 : f32 to vector<96x1xf32>
      %54 = arith.maximumf %52, %53 : vector<96x1xf32>
      %55 = math.rsqrt %54 : vector<96x1xf32>
      %56 = vector.broadcast %55 : vector<96x1xf32> to vector<96x64xf32>
      %57 = arith.mulf %49, %56 : vector<96x64xf32>
      %58 = arith.truncf %57 : vector<96x64xf32> to vector<96x64xbf16>
      %c0_26 = arith.constant 0 : index
      %c0_27 = arith.constant 0 : index
      %59 = vector.load %arg9[%c0_26, %c0_27] : memref<96x64xbf16, #tpu.memory_space<vmem>>, vector<96x64xbf16>
      tpu.vector_store %arg9[%c0_26, %c0_27], %58 {strides = array<i32>} : memref<96x64xbf16, #tpu.memory_space<vmem>>, vector<96x64xbf16>,
    } else {
    }
    %c0 = arith.constant 0 : index
    %c0_1 = arith.constant 0 : index
    %3 = vector.load %arg1[%c0, %c0_1] : memref<32x64xf32, #tpu.memory_space<vmem>>, vector<32x64xf32>
    %4 = arith.mulf %3, %3 : vector<32x64xf32>
    %cst = arith.constant dense<0.000000e+00> : vector<32xf32>
    %5 = vector.multi_reduction <add>, %4, %cst [1] : vector<32x64xf32> to vector<32xf32>
    %6 = vector.shape_cast %5 : vector<32xf32> to vector<32x1xf32>
    %cst_2 = arith.constant 1.000000e-16 : f32
    %7 = vector.broadcast %cst_2 : f32 to vector<32x1xf32>
    %8 = arith.maximumf %6, %7 : vector<32x1xf32>
    %9 = math.rsqrt %8 : vector<32x1xf32>
    %10 = vector.broadcast %9 : vector<32x1xf32> to vector<32x64xf32>
    %11 = arith.mulf %3, %10 : vector<32x64xf32>
    %c32_i32 = arith.constant 32 : i32
    %12 = arith.muli %arg0, %c32_i32 : i32
    %13 = tpu.assume_multiple %12, 32 : i32
    %14 = arith.index_cast %13 : i32 to index
    %c0_3 = arith.constant 0 : index
    %15 = vector.load %arg9[%14, %c0_3] : memref<96x64xbf16, #tpu.memory_space<vmem>>, vector<32x64xbf16>
    %16 = arith.extf %15 : vector<32x64xbf16> to vector<32x64xf32>
    %17 = arith.mulf %11, %16 : vector<32x64xf32>
    %cst_4 = arith.constant dense<0.000000e+00> : vector<32xf32>
    %18 = vector.multi_reduction <add>, %17, %cst_4 [1] : vector<32x64xf32> to vector<32xf32>
    %19 = vector.shape_cast %18 : vector<32xf32> to vector<32x1xf32>
    %20 = arith.truncf %11 : vector<32x64xf32> to vector<32x64xbf16>
    %c0_5 = arith.constant 0 : index
    %c0_6 = arith.constant 0 : index
    %21 = vector.load %arg9[%c0_5, %c0_6] : memref<96x64xbf16, #tpu.memory_space<vmem>>, vector<96x64xbf16>
    %cst_7 = arith.constant dense<0.000000e+00> : vector<32x96xf32>
    %22 = tpu.matmul %20, %21, %cst_7 {dimension_numbers = #tpu.dot_dimension_numbers<[1], [1], [0], [0], [0, 0, 1, 0], [], []>} : vector<32x64xbf16>, vector<96x64xbf16>, vector<32x96xf32> -> vector<32x96xf32>
    %cst_8 = arith.constant 1.000000e+01 : f32
    %23 = vector.broadcast %cst_8 : f32 to vector<32x96xf32>
    %24 = arith.mulf %22, %23 : vector<32x96xf32>
    %25 = math.exp %24 : vector<32x96xf32>
    %c0_9 = arith.constant 0 : index
    %c0_10 = arith.constant 0 : index
    %26 = vector.load %arg3[%c0_9, %c0_10] : memref<32x96xi8, #tpu.memory_space<vmem>>, vector<32x96xi8>
    %27 = arith.sitofp %26 : vector<32x96xi8> to vector<32x96xf32>
    %28 = arith.mulf %25, %27 : vector<32x96xf32>
    %cst_11 = arith.constant dense<0.000000e+00> : vector<32xf32>
    %29 = vector.multi_reduction <add>, %28, %cst_11 [1] : vector<32x96xf32> to vector<32xf32>
    %30 = vector.shape_cast %29 : vector<32xf32> to vector<32x1xf32>
    %cst_12 = arith.constant 1.000000e+01 : f32
    %31 = vector.broadcast %cst_12 : f32 to vector<32x1xf32>
    %32 = arith.mulf %19, %31 : vector<32x1xf32>
    %33 = math.log %30 : vector<32x1xf32>
    %34 = arith.subf %32, %33 : vector<32x1xf32>
    %c0_13 = arith.constant 0 : index
    %c0_14 = arith.constant 0 : index
    %35 = vector.load %arg8[%c0_13, %c0_14] : memref<1x1xf32, #tpu.memory_space<vmem>>, vector<1x1xf32>
    %36 = vector.shape_cast %34 : vector<32x1xf32> to vector<1x32x1xf32>
    %cst_15 = arith.constant dense<0.000000e+00> : vector<1xf32>
    %37 = vector.multi_reduction <add>, %36, %cst_15 [1, 2] : vector<1x32x1xf32> to vector<1xf32>
    %38 = vector.shape_cast %37 : vector<1xf32> to vector<1x1x1xf32>
    %39 = vector.extract %38[0, 0, 0] : f32 from vector<1x1x1xf32>
    %40 = vector.broadcast %39 : f32 to vector<1x1xf32>
    %41 = arith.addf %35, %40 : vector<1x1xf32>
    %c0_16 = arith.constant 0 : index
    %c0_17 = arith.constant 0 : index
    %42 = vector.load %arg8[%c0_16, %c0_17] : memref<1x1xf32, #tpu.memory_space<vmem>>, vector<1x1xf32>
    tpu.vector_store %arg8[%c0_16, %c0_17], %41 {strides = array<i32>} : memref<1x1xf32, #tpu.memory_space<vmem>>, vector<1x1xf32>,
    %c2_i32 = arith.constant 2 : i32
    %43 = arith.cmpi eq, %arg0, %c2_i32 : i32
    %44 = arith.extui %43 : i1 to i32
    %c0_i32_18 = arith.constant 0 : i32
    %45 = arith.cmpi ne, %44, %c0_i32_18 : i32
    scf.if %45 {
      %c0_19 = arith.constant 0 : index
      %c0_20 = arith.constant 0 : index
      %46 = vector.load %arg8[%c0_19, %c0_20] : memref<1x1xf32, #tpu.memory_space<vmem>>, vector<1x1xf32>
      %cst_21 = arith.constant 0.000000e+00 : f32
      %47 = vector.broadcast %cst_21 : f32 to vector<1x1xf32>
      %48 = arith.subf %47, %46 : vector<1x1xf32>
      %cst_22 = arith.constant 0.010416667 : f32
      %49 = vector.broadcast %cst_22 : f32 to vector<1x1xf32>
      %50 = arith.mulf %48, %49 : vector<1x1xf32>
      %c0_23 = arith.constant 0 : index
      %c0_24 = arith.constant 0 : index
      %51 = vector.load %arg4[%c0_23, %c0_24] : memref<2x4xf32, #tpu.memory_space<vmem>>, vector<2x4xf32>
      %cst_25 = arith.constant 1.000000e-30 : f32
      %52 = vector.broadcast %cst_25 : f32 to vector<2x4xf32>
      %53 = arith.maximumf %51, %52 : vector<2x4xf32>
      %54 = math.log %53 : vector<2x4xf32>
      %55 = arith.mulf %51, %54 : vector<2x4xf32>
      %56 = vector.shape_cast %55 : vector<2x4xf32> to vector<1x2x4xf32>
      %cst_26 = arith.constant dense<0.000000e+00> : vector<1xf32>
      %57 = vector.multi_reduction <add>, %56, %cst_26 [1, 2] : vector<1x2x4xf32> to vector<1xf32>
      %58 = vector.shape_cast %57 : vector<1xf32> to vector<1x1x1xf32>
      %59 = vector.extract %58[0, 0, 0] : f32 from vector<1x1x1xf32>
      %60 = vector.broadcast %59 : f32 to vector<1x1xf32>
      %cst_27 = arith.constant 1.250000e-01 : f32
      %61 = vector.broadcast %cst_27 : f32 to vector<1x1xf32>
      %62 = arith.mulf %60, %61 : vector<1x1xf32>
      %cst_28 = arith.constant 1.000000e-01 : f32
      %63 = vector.broadcast %cst_28 : f32 to vector<1x1xf32>
      %64 = arith.mulf %63, %62 : vector<1x1xf32>
      %65 = arith.addf %50, %64 : vector<1x1xf32>
      %c0_29 = arith.constant 0 : index
      %c0_30 = arith.constant 0 : index
      %66 = vector.load %arg5[%c0_29, %c0_30] : memref<1x1xf32, #tpu.memory_space<vmem>>, vector<1x1xf32>
      tpu.vector_store %arg5[%c0_29, %c0_30], %65 {strides = array<i32>} : memref<1x1xf32, #tpu.memory_space<vmem>>, vector<1x1xf32>,
      %c0_31 = arith.constant 0 : index
      %c0_32 = arith.constant 0 : index
      %67 = vector.load %arg6[%c0_31, %c0_32] : memref<1x1xf32, #tpu.memory_space<vmem>>, vector<1x1xf32>
      tpu.vector_store %arg6[%c0_31, %c0_32], %50 {strides = array<i32>} : memref<1x1xf32, #tpu.memory_space<vmem>>, vector<1x1xf32>,
      %c0_33 = arith.constant 0 : index
      %c0_34 = arith.constant 0 : index
      %68 = vector.load %arg7[%c0_33, %c0_34] : memref<1x1xf32, #tpu.memory_space<vmem>>, vector<1x1xf32>
      tpu.vector_store %arg7[%c0_33, %c0_34], %62 {strides = array<i32>} : memref<1x1xf32, #tpu.memory_space<vmem>>, vector<1x1xf32>,
    } else {
    }
    return
  }
  func.func @transform_0(%arg0: i32) -> (i32, i32) {
    %c0_i32 = arith.constant 0 : i32
    %c0_i32_0 = arith.constant 0 : i32
    return %arg0, %c0_i32 : i32, i32
  }
  func.func @transform_2(%arg0: i32) -> (i32, i32) {
    %c0_i32 = arith.constant 0 : i32
    %c0_i32_0 = arith.constant 0 : i32
    return %arg0, %c0_i32 : i32, i32
  }
  func.func @transform_3(%arg0: i32) -> (i32, i32) {
    %c0_i32 = arith.constant 0 : i32
    %c0_i32_0 = arith.constant 0 : i32
    %c0_i32_1 = arith.constant 0 : i32
    return %c0_i32, %c0_i32_0 : i32, i32
  }
  func.func @transform_4(%arg0: i32) -> (i32, i32) {
    %c0_i32 = arith.constant 0 : i32
    %c0_i32_0 = arith.constant 0 : i32
    %c0_i32_1 = arith.constant 0 : i32
    return %c0_i32, %c0_i32_0 : i32, i32
  }
  func.func @transform_5(%arg0: i32) -> (i32, i32) {
    %c0_i32 = arith.constant 0 : i32
    %c0_i32_0 = arith.constant 0 : i32
    %c0_i32_1 = arith.constant 0 : i32
    return %c0_i32, %c0_i32_0 : i32, i32
  }
  func.func @transform_6(%arg0: i32) -> (i32, i32) {
    %c0_i32 = arith.constant 0 : i32
    %c0_i32_0 = arith.constant 0 : i32
    %c0_i32_1 = arith.constant 0 : i32
    return %c0_i32, %c0_i32_0 : i32, i32
  }
}

</mosaic_0001>

<bundles_post_ra>
// kernel: tpu_custom_call.1
= control target key start
LH: loop header
LB: loop body
LE: loop exit
PB: predicated region body
PF: predicated region fallthrough
CT: control target
= control target key end

     0   :  { %12 = vsyncpa [#allocation6], 0  ;;  %s1536_s0 = inlined_call_operand.vmem [shape: f32[96,64], index: 0, kind: input, shape index: {}]   ;;  %s1537_s1 = inlined_call_operand.vmem [shape: bf16[96,64], index: 1, kind: input, shape index: {}]   ;;  %s1538_s2 = inlined_call_operand.vmem [shape: s8[96,96], index: 2, kind: input, shape index: {}]   ;;  %s1539_s3 = inlined_call_operand.vmem [shape: f32[2,4], index: 3, kind: input, shape index: {}]   ;;  %s1540_s4 = inlined_call_operand.hbm [shape: f32[1,1], index: 4, kind: output, shape index: {0}]   ;;  %s1541_s5 = inlined_call_operand.hbm [shape: f32[1,1], index: 5, kind: output, shape index: {1}]   ;;  %s1542_s6 = inlined_call_operand.hbm [shape: f32[1,1], index: 6, kind: output, shape index: {2}]  }
   0x1   :  { %13 = vsyncpa [#allocation8], 0  ;;  %s1239_s21 = smov 0  }
   0x2 LB: > { %s1245_s22 = sadd.s32 4294967295, %s1198_s21   ;;  %p921_p0 = scmp.ge.s32.totalorder %s1198_s21, 1  ;;  %s1198_s21 = sphi %s1239_s21, %s19_s21  }
   0x3   : > { %p190_p1 = scmp.lt.s32.totalorder %s1198_s21, 4 }
   0x5   : > { %p191_p2 = pnand %p921_p0, %p190_p1 }
   0x6   : > { %s922_s23 = sshll.u32 (!%p191_p2), %s1245_s22, 2  ;;  %p223_p3 = scmp.lt.s32.totalorder (!%p191_p2), %s1245_s22, 2 }
   0x7   : > { %194 = sbr.rel (%p191_p2) target bundleno = 1040 (0x410), region = 32  ;;  %p218_p4 = scmp.lt.s32.totalorder (!%p191_p2), %s922_s23, 11 }
   0x8   : > { %p925_p5 = scmp.ne.s32.totalorder (!%p191_p2), %s1245_s22, 0 }
   0xc   : > { %s224_s24 = scalar_select %p223_p3, %s1245_s22, 2 }
   0xd   : > { %s1544_s23 = smov (!%p218_p4, %s922_s23), 11  ;;  %231 = sbr.rel (%p925_p5) target bundleno = 205 (0xcd), region = 36 }
   0xe   : > { %s924_s25 = sshll.u32 %s224_s24, 3  ;;  %s923_s26 = sshll.u32 %s1544_s23, 3 }
   0xf   : > { %s1255_s29 = scalar_lea.vmem %s1538_s2, %s924_s25  ;;  %s1260_s8 = scalar_lea.vmem %s1536_s0, %s923_s26 }
  0x12   : > { %vm232_vm0 = vcmask 0   ;;  %v244_v0 = vld [vmem:[%s1537_s1] sm:$0xff]  ;;  %v246_v1 = vld [vmem:[%s1537_s1 + $0x8] sm:$0xff]  ;;  %v1200_v2 = vmov 0.0   ;;  %v248_v3 = vld [vmem:[%s1537_s1 + $0x10] sm:$0xff] }
  0x13   : > { %233 = vst.msk [vmem:[#allocation2] sm:$0x1] %vm232_vm0, %v1200_v2  ;;  %v250_v4 = vld [vmem:[%s1537_s1 + $0x18] sm:$0xff]  ;;  %v252_v5 = vld [vmem:[%s1537_s1 + $0x20] sm:$0xff]  ;;  %v254_v6 = vld [vmem:[%s1537_s1 + $0x28] sm:$0xff] }
  0x14   : > { %245 = vst [vmem:[#allocation3] sm:$0xff] %v244_v0 }
  0x15   : > { %247 = vst [vmem:[#allocation3 + $0x8] sm:$0xff] %v246_v1 }
  0x16   : > { %249 = vst [vmem:[#allocation3 + $0x10] sm:$0xff] %v248_v3 }
  0x17   : > { %251 = vst [vmem:[#allocation3 + $0x18] sm:$0xff] %v250_v4 }
  0x18   : > { %253 = vst [vmem:[#allocation3 + $0x20] sm:$0xff] %v252_v5 }
  0x19   : > { %255 = vst [vmem:[#allocation3 + $0x28] sm:$0xff] %v254_v6 }
  0x1a   : > { %261 = vsyncadd [#allocation4], 768 }
  0x1b   : > { %1186 = dma.done.wait [#allocation4], 768 }
  0x1c   : > { %1187 = vsyncadd [#allocation4], 4294966528  ;;  %v1002_v8 = vld [vmem:[#allocation3 + $0x8] sm:$0xff]   ;;  %v971_v9 = vld [vmem:[#allocation3] sm:$0xff]   ;;  %vm302_vm1 = vcmask 523264   ;;  %vm495_vm2 = vcmask 519168  }
  0x1d   : > { %v1003_v7 = vld [vmem:[#allocation3 + $0x10] sm:$0xff]   ;;  %v1283_v11 = vunpack.c.l.bf16 %v1002_v8  ;;  %v1285_v12 = vunpack.c.l.bf16 %v971_v9  ;;  %v1295_v17 = vunpack.c.h.bf16 %v1002_v8  ;;  %v1297_v18 = vunpack.c.h.bf16 %v971_v9 }
  0x1e   : > { %v1281_v10 = vunpack.c.l.bf16 %v1003_v7  ;;  %v1287_v13 = vunpack.c.h.bf16 %v1003_v7  ;;  %v1004_v26 = vld [vmem:[#allocation3 + $0x18] sm:$0xff]  }
  0x1f   : > { %v292_v15 = vmul.f32 %v1283_v11, %v1283_v11  ;;  %v290_v16 = vmul.f32 %v1285_v12, %v1285_v12  ;;  %v293_v23 = vmul.f32 %v1295_v17, %v1295_v17  ;;  %v291_v24 = vmul.f32 %v1297_v18, %v1297_v18  ;;  %v1005_v25 = vld [vmem:[#allocation3 + $0x20] sm:$0xff]  }
  0x20   : > { %v294_v14 = vmul.f32 %v1281_v10, %v1281_v10  ;;  %v295_v22 = vmul.f32 %v1287_v13, %v1287_v13  ;;  %v1310_v29 = vunpack.c.l.bf16 %v1005_v25  ;;  %v1312_v30 = vunpack.c.h.bf16 %v1004_v26  ;;  %v1006_v36 = vld [vmem:[#allocation3 + $0x28] sm:$0xff]  }
  0x21   : > { %v309_v20 = vsel %vm302_vm1, %v292_v15, 0.0  ;;  %v303_v21 = vsel %vm302_vm1, %v290_v16, 0.0  ;;  %v312_v28 = vsel %vm302_vm1, %v293_v23, 0.0  ;;  %v306_v31 = vsel %vm302_vm1, %v291_v24, 0.0 }
  0x22   : > { %v315_v19 = vsel %vm302_vm1, %v294_v14, 0.0  ;;  %310 = vadd.xlane.f32.xlu1 %v309_v20  ;;  %304 = vadd.xlane.f32.xlu0 %v303_v21  ;;  %v318_v27 = vsel %vm302_vm1, %v295_v22, 0.0  ;;  %v1315_v32 = vunpack.c.l.bf16 %v1004_v26  ;;  %v298_v33 = vmul.f32 %v1310_v29, %v1310_v29 }
  0x23   : > { %316 = vadd.xlane.f32.xlu2 %v315_v19  ;;  %v297_v34 = vmul.f32 %v1312_v30, %v1312_v30  ;;  %v1325_v39 = vunpack.c.h.bf16 %v1006_v36  ;;  %v1327_v40 = vunpack.c.l.bf16 %v1006_v36  ;;  %v1330_v42 = vunpack.c.h.bf16 %v1005_v25 }
  0x24   : > { %v296_v35 = vmul.f32 %v1315_v32, %v1315_v32  ;;  %v327_v37 = vsel %vm302_vm1, %v298_v33, 0.0 }
  0x25   : > { %v324_v38 = vsel %vm302_vm1, %v297_v34, 0.0  ;;  %v301_v43 = vmul.f32 %v1325_v39, %v1325_v39  ;;  %v300_v44 = vmul.f32 %v1327_v40, %v1327_v40  ;;  %v299_v45 = vmul.f32 %v1330_v42, %v1330_v42 }
  0x26   : > { %v321_v41 = vsel %vm302_vm1, %v296_v35, 0.0 }
  0x27   : > { %v336_v46 = vsel %vm302_vm1, %v301_v43, 0.0  ;;  %v333_v47 = vsel %vm302_vm1, %v300_v44, 0.0  ;;  %v330_v48 = vsel %vm302_vm1, %v299_v45, 0.0 }
  0x2a   : > { %313 = vadd.xlane.f32.xlu1 %v312_v28  ;;  %307 = vadd.xlane.f32.xlu0 %v306_v31 }
  0x2b   : > { %319 = vadd.xlane.f32.xlu2 %v318_v27 }
  0x32   : > { %325 = vadd.xlane.f32.xlu1 %v324_v38  ;;  %322 = vadd.xlane.f32.xlu0 %v321_v41 }
  0x33   : > { %328 = vadd.xlane.f32.xlu2 %v327_v37 }
  0x3a   : > { %334 = vadd.xlane.f32.xlu1 %v333_v47  ;;  %331 = vadd.xlane.f32.xlu0 %v330_v48 }
  0x3b   : > { %337 = vadd.xlane.f32.xlu2 %v336_v46 }
  0x95   : > { %v311_v50 = vpop.xlane.xlu1 %310  ;;  %v305_v53 = vpop.xlane.xlu0 %304 }
  0x96   : > { %v317_v49 = vpop.xlane.xlu2 %316  ;;  %v341_v52 = vmax.f32 %v311_v50, 1e-16  ;;  %v339_v54 = vmax.f32 %v305_v53, 1e-16 }
  0x97   : > { %v343_v51 = vmax.f32 %v317_v49, 1e-16 }
  0x98   : > { %vm377_vm5 = vweird.f32 %v341_v52  ;;  %vm357_vm7 = vweird.f32 %v339_v54 }
  0x99   : > { %1048 = vrsqrt.f32 %v343_v51  ;;  %vm397_vm3 = vweird.f32 %v343_v51 }
  0x9a   : > { %1050 = vrsqrt.f32 %v341_v52 }
  0x9b   : > { %1052 = vrsqrt.f32 %v339_v54 }
  0x9d   : > { %v314_v56 = vpop.xlane.xlu1 %313  ;;  %v308_v60 = vpop.xlane.xlu0 %307 }
  0x9e   : > { %v320_v55 = vpop.xlane.xlu2 %319  ;;  %v1343_v59 = vmax.f32 %v314_v56, 1e-16  ;;  %v1345_v63 = vmax.f32 %v308_v60, 1e-16 }
  0x9f   : > { %v1049_v57 = vpop.eup %1048  ;;  %v1341_v58 = vmax.f32 %v320_v55, 1e-16 }
  0xa0   : > { %v1051_v61 = vpop.eup %1050  ;;  %v392_v62 = vmul.f32 %v1049_v57, %v343_v51  ;;  %vm398_vm4 = vweird.f32 %v1049_v57  ;;  %vm387_vm13 = vweird.f32 %v1343_v59 }
  0xa1   : > { %v1053_v0 = vpop.eup %1052  ;;  %v372_v1 = vmul.f32 %v1051_v61, %v341_v52  ;;  %1054 = vrsqrt.f32 %v1341_v58  ;;  %vm378_vm6 = vweird.f32 %v1051_v61  ;;  %vm407_vm9 = vweird.f32 %v1341_v58  ;;  %vm399_vm10 = vmor %vm397_vm3, %vm398_vm4 }
  0xa2   : > { %v393_v2 = vmul.f32 %v1049_v57, %v392_v62  ;;  %v352_v3 = vmul.f32 %v1053_v0, %v339_v54  ;;  %1056 = vrsqrt.f32 %v1343_v59  ;;  %vm358_vm8 = vweird.f32 %v1053_v0  ;;  %vm379_vm11 = vmor %vm377_vm5, %vm378_vm6 }
  0xa3   : > { %v373_v4 = vmul.f32 %v1051_v61, %v372_v1  ;;  %1058 = vrsqrt.f32 %v1345_v63  ;;  %vm359_vm12 = vmor %vm357_vm7, %vm358_vm8  ;;  %vm367_vm3 = vweird.f32 %v1345_v63 }
  0xa4   : > { %v394_v5 = vmul.f32 0.5, %v393_v2  ;;  %v353_v6 = vmul.f32 %v1053_v0, %v352_v3 }
  0xa5   : > { %v374_v7 = vmul.f32 0.5, %v373_v4  ;;  %v326_v15 = vpop.xlane.xlu1 %325  ;;  %v323_v31 = vpop.xlane.xlu0 %322 }
  0xa6   : > { %v395_v8 = vsub.f32 1.5, %v394_v5  ;;  %v354_v9 = vmul.f32 0.5, %v353_v6  ;;  %v329_v14 = vpop.xlane.xlu2 %328  ;;  %v1366_v28 = vmax.f32 %v326_v15, 1e-16  ;;  %v1385_v55 = vmax.f32 %v323_v31, 1e-16 }
  0xa7   : > { %v1350_v16 = vpop.eup %1054  ;;  %v375_v19 = vsub.f32 1.5, %v374_v7  ;;  %v1352_v20 = vmax.f32 %v329_v14, 1e-16 }
  0xa8   : > { %v1354_v21 = vpop.eup %1056  ;;  %v396_v22 = vmul.f32 %v1049_v57, %v395_v8  ;;  %v355_v23 = vsub.f32 1.5, %v354_v9  ;;  %v402_v24 = vmul.f32 %v1350_v16, %v1341_v58  ;;  %vm408_vm14 = vweird.f32 %v1350_v16 }
  0xa9   : > { %v1359_v25 = vpop.eup %1058  ;;  %v376_v26 = vmul.f32 %v1051_v61, %v375_v19  ;;  %v382_v27 = vmul.f32 %v1354_v21, %v1343_v59  ;;  %1060 = vrsqrt.f32 %v1352_v20  ;;  %vm388_vm15 = vweird.f32 %v1354_v21  ;;  %vm409_vm1 = vmor %vm407_vm9, %vm408_vm14 }
  0xaa   : > { %v400_v33 = vsel %vm399_vm10, %v1049_v57, %v396_v22  ;;  %v356_v34 = vmul.f32 %v1053_v0, %v355_v23  ;;  %v403_v35 = vmul.f32 %v1350_v16, %v402_v24  ;;  %v362_v36 = vmul.f32 %v1359_v25, %v1345_v63  ;;  %vm389_vm4 = vmor %vm387_vm13, %vm388_vm15 }
  0xab   : > { %v475_v37 = vmul.f32 %v1281_v10, %v400_v33  ;;  %v380_v38 = vsel %vm379_vm11, %v1051_v61, %v376_v26  ;;  %v383_v41 = vmul.f32 %v1354_v21, %v382_v27  ;;  %1062 = vrsqrt.f32 %v1366_v28 }
  0xac   : > { %v473_v43 = vmul.f32 %v1283_v11, %v380_v38  ;;  %v360_v44 = vsel %vm359_vm12, %v1053_v0, %v356_v34  ;;  %v404_v45 = vmul.f32 0.5, %v403_v35  ;;  %v363_v46 = vmul.f32 %v1359_v25, %v362_v36 }
  0xad   : > { %v487_v47 = vpack.c.bf16 %v475_v37, %v475_v37  ;;  %v471_v48 = vmul.f32 %v1285_v12, %v360_v44  ;;  %v384_v10 = vmul.f32 0.5, %v383_v41  ;;  %v335_v56 = vpop.xlane.xlu1 %334  ;;  %vm368_vm0 = vweird.f32 %v1359_v25  ;;  %v332_v4 = vpop.xlane.xlu0 %331 }
  0xae   : > { %v485_v49 = vpack.c.bf16 %v473_v43, %v473_v43  ;;  %v405_v50 = vsub.f32 1.5, %v404_v45  ;;  %v364_v51 = vmul.f32 0.5, %v363_v46  ;;  %v338_v52 = vpop.xlane.xlu2 %337  ;;  %1064 = vrsqrt.f32 %v1385_v55  ;;  %vm369_vm5 = vmor %vm367_vm3, %vm368_vm0 }
  0xaf   : > { %v1061_v53 = vpop.eup %1060  ;;  %500 = vst.msk [vmem:[#allocation3 + $0x10] sm:$0xf] %vm495_vm2, %v487_v47  ;;  %v483_v11 = vpack.c.bf16 %v471_v48, %v471_v48  ;;  %v385_v54 = vsub.f32 1.5, %v384_v10  ;;  %v1399_v62 = vmax.f32 %v338_v52, 1e-16  ;;  %vm437_vm7 = vweird.f32 %v1352_v20 }
  0xb0   : > { %498 = vst.msk [vmem:[#allocation3 + $0x8] sm:$0xf] %vm495_vm2, %v485_v49  ;;  %v406_v12 = vmul.f32 %v1350_v16, %v405_v50  ;;  %v365_v57 = vsub.f32 1.5, %v364_v51  ;;  %v432_v60 = vmul.f32 %v1061_v53, %v1352_v20  ;;  %v1407_v58 = vmax.f32 %v335_v56, 1e-16 }
  0xb1   : > { %496 = vst.msk [vmem:[#allocation3] sm:$0xf] %vm495_vm2, %v483_v11  ;;  %v386_v61 = vmul.f32 %v1354_v21, %v385_v54  ;;  %1066 = vrsqrt.f32 %v1399_v62  ;;  %v1063_v5 = vpop.eup %1062  ;;  %vm438_vm6 = vweird.f32 %v1061_v53  ;;  %vm427_vm10 = vweird.f32 %v1366_v28 }
  0xb2   : > { %v410_v0 = vsel %vm409_vm1, %v1350_v16, %v406_v12  ;;  %v366_v1 = vmul.f32 %v1359_v25, %v365_v57  ;;  %v433_v2 = vmul.f32 %v1061_v53, %v432_v60  ;;  %1068 = vrsqrt.f32 %v1407_v58  ;;  %vm439_vm8 = vmor %vm437_vm7, %vm438_vm6 }
  0xb3   : > { %v476_v3 = vmul.f32 %v1287_v13, %v410_v0  ;;  %v390_v63 = vsel %vm389_vm4, %v1354_v21, %v386_v61  ;;  %v422_v13 = vmul.f32 %v1063_v5, %v1366_v28  ;;  %v1419_v16 = vmax.f32 %v332_v4, 1e-16 }
  0xb4   : > { %v474_v6 = vmul.f32 %v1295_v17, %v390_v63  ;;  %v370_v59 = vsel %vm369_vm5, %v1359_v25, %v366_v1  ;;  %v434_v7 = vmul.f32 0.5, %v433_v2  ;;  %v1065_v19 = vpop.eup %1064  ;;  %vm428_vm9 = vweird.f32 %v1063_v5 }
  0xb5   : > { %v488_v8 = vpack.c.bf16 %v476_v3, %v476_v3  ;;  %v472_v9 = vmul.f32 %v1297_v18, %v370_v59  ;;  %v423_v17 = vmul.f32 %v1063_v5, %v422_v13  ;;  %v412_v23 = vmul.f32 %v1065_v19, %v1385_v55  ;;  %vm429_vm11 = vmor %vm427_vm10, %vm428_vm9 }
  0xb6   : > { %v486_v14 = vpack.c.bf16 %v474_v6, %v474_v6  ;;  %v435_v15 = vsub.f32 1.5, %v434_v7  ;;  %1070 = vrsqrt.f32 %v1419_v16  ;;  %vm418_vm12 = vweird.f32 %v1065_v19 }
  0xb7   : > { %501 = vst.msk [vmem:[#allocation3 + $0x14] sm:$0xf] %vm495_vm2, %v488_v8  ;;  %v484_v21 = vpack.c.bf16 %v472_v9, %v472_v9  ;;  %v1067_v18 = vpop.eup %1066  ;;  %v424_v24 = vmul.f32 0.5, %v423_v17  ;;  %v413_v27 = vmul.f32 %v1065_v19, %v412_v23  ;;  %vm417_vm13 = vweird.f32 %v1385_v55 }
  0xb8   : > { %499 = vst.msk [vmem:[#allocation3 + $0xc] sm:$0xf] %vm495_vm2, %v486_v14  ;;  %v436_v22 = vmul.f32 %v1061_v53, %v435_v15  ;;  %v1069_v25 = vpop.eup %1068  ;;  %v462_v31 = vmul.f32 %v1067_v18, %v1399_v62  ;;  %vm468_vm14 = vweird.f32 %v1067_v18  ;;  %vm419_vm15 = vmor %vm417_vm13, %vm418_vm12  ;;  %vm467_vm1 = vweird.f32 %v1399_v62 }
  0xb9   : > { %497 = vst.msk [vmem:[#allocation3 + $0x4] sm:$0xf] %vm495_vm2, %v484_v21  ;;  %v425_v34 = vsub.f32 1.5, %v424_v24  ;;  %v452_v20 = vmul.f32 %v1069_v25, %v1407_v58  ;;  %v414_v35 = vmul.f32 0.5, %v413_v27  ;;  %vm458_vm0 = vweird.f32 %v1069_v25  ;;  %vm469_vm3 = vmor %vm467_vm1, %vm468_vm14 }
  0xba   : > { %v440_v26 = vsel %vm439_vm8, %v1061_v53, %v436_v22  ;;  %v463_v36 = vmul.f32 %v1067_v18, %v462_v31  ;;  %vm457_vm4 = vweird.f32 %v1407_v58  ;;  %vm447_vm7 = vweird.f32 %v1419_v16 }
  0xbb   : > { %v479_v33 = vmul.f32 %v1310_v29, %v440_v26  ;;  %v426_v38 = vmul.f32 %v1063_v5, %v425_v34  ;;  %v453_v41 = vmul.f32 %v1069_v25, %v452_v20  ;;  %v415_v44 = vsub.f32 1.5, %v414_v35  ;;  %vm459_vm5 = vmor %vm457_vm4, %vm458_vm0 }
  0xbc   : > { %v1071_v43 = vpop.eup %1070  ;;  %v464_v45 = vmul.f32 0.5, %v463_v36 }
  0xbd   : > { %v491_v37 = vpack.c.bf16 %v479_v33, %v479_v33  ;;  %v430_v46 = vsel %vm429_vm11, %v1063_v5, %v426_v38  ;;  %v454_v29 = vmul.f32 0.5, %v453_v41  ;;  %v442_v47 = vmul.f32 %v1071_v43, %v1419_v16 }
  0xbe   : > { %v478_v48 = vmul.f32 %v1312_v30, %v430_v46  ;;  %v416_v10 = vmul.f32 %v1065_v19, %v415_v44  ;;  %v465_v49 = vsub.f32 1.5, %v464_v45  ;;  %vm448_vm6 = vweird.f32 %v1071_v43 }
  0xbf   : > { %504 = vst.msk [vmem:[#allocation3 + $0x20] sm:$0xf] %vm495_vm2, %v491_v37  ;;  %v455_v28 = vsub.f32 1.5, %v454_v29  ;;  %v443_v50 = vmul.f32 %v1071_v43, %v442_v47  ;;  %vm449_vm8 = vmor %vm447_vm7, %vm448_vm6 }
  0xc0   : > { %v490_v51 = vpack.c.bf16 %v478_v48, %v478_v48  ;;  %v420_v52 = vsel %vm419_vm15, %v1065_v19, %v416_v10  ;;  %v466_v53 = vmul.f32 %v1067_v18, %v465_v49 }
  0xc1   : > { %v477_v11 = vmul.f32 %v1315_v32, %v420_v52  ;;  %v456_v54 = vmul.f32 %v1069_v25, %v455_v28  ;;  %v444_v55 = vmul.f32 0.5, %v443_v50 }
  0xc2   : > { %503 = vst.msk [vmem:[#allocation3 + $0x1c] sm:$0xf] %vm495_vm2, %v490_v51  ;;  %v470_v30 = vsel %vm469_vm3, %v1067_v18, %v466_v53 }
  0xc3   : > { %v489_v56 = vpack.c.bf16 %v477_v11, %v477_v11  ;;  %v482_v12 = vmul.f32 %v1325_v39, %v470_v30  ;;  %v460_v57 = vsel %vm459_vm5, %v1069_v25, %v456_v54  ;;  %v445_v60 = vsub.f32 1.5, %v444_v55 }
  0xc4   : > { %v481_v61 = vmul.f32 %v1327_v40, %v460_v57 }
  0xc5   : > { %502 = vst.msk [vmem:[#allocation3 + $0x18] sm:$0xf] %vm495_vm2, %v489_v56  ;;  %v494_v32 = vpack.c.bf16 %v482_v12, %v482_v12  ;;  %v446_v62 = vmul.f32 %v1071_v43, %v445_v60 }
  0xc6   : > { %v493_v0 = vpack.c.bf16 %v481_v61, %v481_v61 }
  0xc7   : > { %507 = vst.msk [vmem:[#allocation3 + $0x2c] sm:$0xf] %vm495_vm2, %v494_v32  ;;  %v450_v1 = vsel %vm449_vm8, %v1071_v43, %v446_v62 }
  0xc8   : > { %506 = vst.msk [vmem:[#allocation3 + $0x28] sm:$0xf] %vm495_vm2, %v493_v0  ;;  %v480_v2 = vmul.f32 %v1330_v42, %v450_v1 }
  0xca   : > { %v492_v39 = vpack.c.bf16 %v480_v2, %v480_v2 }
  0xcc   : > { %505 = vst.msk [vmem:[#allocation3 + $0x24] sm:$0xf] %vm495_vm2, %v492_v39 }
  0xcd PF: > { %v1448_v40 = vld [vmem:[%s1260_s8 + $0x10] sm:$0xff]  ;;  %vm516_vm9 = vcmask 523264   ;;  %v1451_v58 = vld [vmem:[%s1260_s8] sm:$0xff]  ;;  %v1458_v4 = vld [vmem:[%s1260_s8 + $0x18] sm:$0xff]  ;;  %s926_s23 = sshll.u32 %s1245_s22, 5  ;;  %vm718_vm6 = vcmask 785408  }
  0xce   : > { %v514_v3 = vmul.f32 %v1448_v40, %v1448_v40  ;;  %v512_v63 = vmul.f32 %v1451_v58, %v1451_v58  ;;  %v1461_v5 = vld [vmem:[%s1260_s8 + $0x8] sm:$0xff]  ;;  %v515_v8 = vmul.f32 %v1458_v4, %v1458_v4  ;;  %v967_v19 = vld [vmem:[#allocation3 + $0x18] sm:$0xff]  ;;  %v966_v17 = vld [vmem:[#allocation3 + $0x10] sm:$0xff]  ;;  %s578_s24 = sshra.s32 %s926_s23, 3  ;;  %vm748_vm7 = vcmask 7168   ;;  %p954_p6 = scmp.ne.s32.totalorder %s1245_s22, 2 }
  0xcf   : > { %v969_v42 = vld [vmem:[#allocation3 + $0x28] sm:$0xff]  ;;  %v513_v9 = vmul.f32 %v1461_v5, %v1461_v5  ;;  %v666_v21 = vsel %vm516_vm9, %v967_v19, 0  ;;  %v663_v22 = vsel %vm516_vm9, %v966_v17, 0  ;;  %v964_v24 = vld [vmem:[#allocation3] sm:$0xff]  ;;  %s927_s25 = sshll.u32 %s578_s24, 2  ;;  %vm767_vm8 = vcmask 0  }
  0xd0   : > { %v523_v6 = vsel %vm516_vm9, %v514_v3, 0.0  ;;  %v517_v59 = vsel %vm516_vm9, %v512_v63, 0.0  ;;  %v672_v7 = vsel %vm516_vm9, %v969_v42, 0  ;;  %v526_v14 = vsel %vm516_vm9, %v515_v8, 0.0  ;;  %v965_v23 = vld [vmem:[#allocation3 + $0x8] sm:$0xff]  ;;  %s581_s26 = scalar_lea.vmem [#allocation3], %s927_s25 }
  0xd1   : > { %524 = vadd.xlane.f32.xlu1 %v523_v6  ;;  %518 = vadd.xlane.f32.xlu0 %v517_v59  ;;  %v520_v15 = vsel %vm516_vm9, %v513_v9, 0.0  ;;  %v660_v18 = vsel %vm516_vm9, %v965_v23, 0  ;;  %v657_v25 = vsel %vm516_vm9, %v964_v24, 0 }
  0xd2   : > { %676 = vmatpush.bf16.xpose.msra.mxu0 %v672_v7  ;;  %1008 = vmatpush.bf16.xpose.msra.mxu1 %v672_v7  ;;  %v705_v7 = vld [vmem:[%s1255_s29] sm:$0xff] }
  0xd3   : > { %v968_v13 = vld [vmem:[#allocation3 + $0x20] sm:$0xff]  ;;  %v708_v9 = vunpack.c.2.s8 %v705_v7  ;;  %v709_v24 = vunpack.c.3.s8 %v705_v7 }
  0xd4   : > { %v669_v16 = vsel %vm516_vm9, %v968_v13, 0 }
  0xd5   : > { %v712_v13 = vcvt.s32.f32 %v708_v9 }
  0xd9   : > { %527 = vadd.xlane.f32.xlu1 %v526_v14  ;;  %521 = vadd.xlane.f32.xlu0 %v520_v15 }
  0xda   : > { %677 = vmatpush.bf16.xpose.msra.mxu0 %v669_v16  ;;  %1009 = vmatpush.bf16.xpose.msra.mxu1 %v669_v16 }
  0xe2   : > { %678 = vmatpush.bf16.xpose.msra.mxu0 %v666_v21  ;;  %1010 = vmatpush.bf16.xpose.msra.mxu1 %v666_v21 }
  0xea   : > { %679 = vmatpush.bf16.xpose.msra.mxu0 %v663_v22  ;;  %1011 = vmatpush.bf16.xpose.msra.mxu1 %v663_v22 }
  0xf2   : > { %680 = vmatpush.bf16.xpose.msra.mxu0 %v660_v18  ;;  %1012 = vmatpush.bf16.xpose.msra.mxu1 %v660_v18 }
  0xfa   : > { %681 = vmatpush.bf16.xpose.msra.mxu0 %v657_v25  ;;  %1013 = vmatpush.bf16.xpose.msra.mxu1 %v657_v25 }
 0x144   : > { %v525_v26 = vpop.xlane.xlu1 %524  ;;  %v519_v27 = vpop.xlane.xlu0 %518 }
 0x145   : > { %v531_v31 = vmax.f32 %v525_v26, 1e-16  ;;  %v529_v33 = vmax.f32 %v519_v27, 1e-16  ;;  %v707_v26 = vunpack.c.1.s8 %v705_v7  ;;  %v995_v27 = vld [vmem:[%s581_s26] sm:$0xff]  }
 0x147   : > { %1072 = vrsqrt.f32 %v531_v31  ;;  %vm559_vm2 = vweird.f32 %v531_v31  ;;  %vm539_vm15 = vweird.f32 %v529_v33 }
 0x148   : > { %1074 = vrsqrt.f32 %v529_v33 }
 0x14c   : > { %v528_v34 = vpop.xlane.xlu1 %527  ;;  %v522_v20 = vpop.xlane.xlu0 %521 }
 0x14d   : > { %v1073_v35 = vpop.eup %1072  ;;  %v532_v36 = vmax.f32 %v528_v34, 1e-16  ;;  %v530_v37 = vmax.f32 %v522_v20, 1e-16  ;;  %v713_v20 = vcvt.s32.f32 %v709_v24 }
 0x14e   : > { %v1075_v38 = vpop.eup %1074  ;;  %v554_v41 = vmul.f32 %v1073_v35, %v531_v31  ;;  %vm560_vm10 = vweird.f32 %v1073_v35 }
 0x14f   : > { %v534_v43 = vmul.f32 %v1075_v38, %v529_v33  ;;  %1076 = vrsqrt.f32 %v532_v36  ;;  %vm540_vm11 = vweird.f32 %v1075_v38  ;;  %vm569_vm12 = vweird.f32 %v532_v36  ;;  %vm561_vm14 = vmor %vm559_vm2, %vm560_vm10 }
 0x150   : > { %v555_v44 = vmul.f32 %v1073_v35, %v554_v41  ;;  %1078 = vrsqrt.f32 %v530_v37  ;;  %vm541_vm1 = vmor %vm539_vm15, %vm540_vm11  ;;  %vm549_vm4 = vweird.f32 %v530_v37  ;;  %v997_v33 = vunpack.c.h.bf16 %v995_v27 }
 0x151   : > { %v535_v45 = vmul.f32 %v1075_v38, %v534_v43 }
 0x152   : > { %v556_v46 = vmul.f32 0.5, %v555_v44 }
 0x153   : > { %v536_v29 = vmul.f32 0.5, %v535_v45 }
 0x154   : > { %v557_v10 = vsub.f32 1.5, %v556_v46 }
 0x155   : > { %v1077_v47 = vpop.eup %1076  ;;  %v537_v28 = vsub.f32 1.5, %v536_v29 }
 0x156   : > { %v1079_v48 = vpop.eup %1078  ;;  %v564_v49 = vmul.f32 %v1077_v47, %v532_v36  ;;  %v558_v53 = vmul.f32 %v1073_v35, %v557_v10  ;;  %vm570_vm13 = vweird.f32 %v1077_v47 }
 0x157   : > { %v544_v50 = vmul.f32 %v1079_v48, %v530_v37  ;;  %v538_v54 = vmul.f32 %v1075_v38, %v537_v28  ;;  %vm550_vm0 = vweird.f32 %v1079_v48  ;;  %vm571_vm3 = vmor %vm569_vm12, %vm570_vm13 }
 0x158   : > { %v565_v51 = vmul.f32 %v1077_v47, %v564_v49  ;;  %v562_v57 = vsel %vm561_vm14, %v1073_v35, %v558_v53  ;;  %vm551_vm5 = vmor %vm549_vm4, %vm550_vm0  ;;  %v711_v35 = vcvt.s32.f32 %v707_v26 }
 0x159   : > { %v545_v52 = vmul.f32 %v1079_v48, %v544_v50  ;;  %v542_v61 = vsel %vm541_vm1, %v1075_v38, %v538_v54  ;;  %v575_v0 = vmul.f32 %v562_v57, %v1448_v40  ;;  %v1007_v38 = vld [vmem:[%s581_s26 + $0x8] sm:$0xff]  }
 0x15a   : > { %v566_v11 = vmul.f32 0.5, %v565_v51  ;;  %v573_v2 = vmul.f32 %v542_v61, %v1451_v58  ;;  %v706_v58 = vunpack.c.0.s8 %v705_v7  ;;  %v1000_v29 = vunpack.c.l.bf16 %v1007_v38 }
 0x15b   : > { %v546_v55 = vmul.f32 0.5, %v545_v52  ;;  %v1001_v51 = vunpack.c.h.bf16 %v1007_v38 }
 0x15c   : > { %v567_v30 = vsub.f32 1.5, %v566_v11  ;;  %v710_v16 = vcvt.s32.f32 %v706_v58  ;;  %v592_v10 = vmul.f32 %v1000_v29, %v575_v0 }
 0x15d   : > { %v547_v56 = vsub.f32 1.5, %v546_v55 }
 0x15e   : > { %v568_v12 = vmul.f32 %v1077_v47, %v567_v30  ;;  %v600_v28 = vsel %vm516_vm9, %v592_v10, 0.0 }
 0x15f   : > { %v548_v60 = vmul.f32 %v1079_v48, %v547_v56 }
 0x160   : > { %v572_v32 = vsel %vm571_vm3, %v1077_v47, %v568_v12 }
 0x161   : > { %v552_v62 = vsel %vm551_vm5, %v1079_v48, %v548_v60  ;;  %v1479_v1 = vmul.f32 %v572_v32, %v1458_v4  ;;  %v996_v48 = vunpack.c.l.bf16 %v995_v27 }
 0x162   : > { %v574_v39 = vmul.f32 %v552_v62, %v1461_v5 }
 0x163   : > { %v607_v3 = vpack.c.bf16 %v1479_v1, %v575_v0  ;;  %v590_v49 = vmul.f32 %v996_v48, %v573_v2  ;;  %v593_v52 = vmul.f32 %v1001_v51, %v1479_v1 }
 0x164   : > { %v606_v63 = vpack.c.bf16 %v574_v39, %v573_v2  ;;  %v591_v36 = vmul.f32 %v997_v33, %v574_v39 }
 0x165   : > { %953 = vmatmul.msk.bf16.vlgmr.msra.gmra.mxu1 %vm516_vm9, %v607_v3  ;;  %v594_v50 = vsel %vm516_vm9, %v590_v49, 0.0  ;;  %v603_v53 = vsel %vm516_vm9, %v593_v52, 0.0 }
 0x166   : > { %952 = vmatmul.msk.bf16.vlgmr.msra.gmra.mxu0 %vm516_vm9, %v606_v63  ;;  %v597_v46 = vsel %vm516_vm9, %v591_v36, 0.0 }
 0x1e2   : > { %v688_v42 = vpop.f32.mrf.mxu1 }
 0x1e3   : > { %v683_v6 = vpop.f32.mrf.mxu0  ;;  %v695_v59 = vmul.f32 10.0, %v688_v42 }
 0x1e4   : > { %v693_v40 = vmul.f32 10.0, %v683_v6 }
 0x1e5   : > { %v701_v8 = vmul.f32 1.442695, %v695_v59 }
 0x1e6   : > { %v697_v4 = vmul.f32 1.442695, %v693_v40 }
 0x1e7   : > { %1080 = vpow2.f32 %v701_v8 }
 0x1e8   : > { %1082 = vpow2.f32 %v697_v4 }
 0x1ea   : > { %v690_v5 = vpop.f32.mrf.mxu1 }
 0x1eb   : > { %v685_v14 = vpop.f32.mrf.mxu0  ;;  %v696_v15 = vmul.f32 10.0, %v690_v5 }
 0x1ec   : > { %v694_v19 = vmul.f32 10.0, %v685_v14 }
 0x1ed   : > { %v1081_v21 = vpop.eup %1080  ;;  %v703_v17 = vmul.f32 1.442695, %v696_v15 }
 0x1ee   : > { %v1083_v22 = vpop.eup %1082  ;;  %v699_v23 = vmul.f32 1.442695, %v694_v19  ;;  %v716_v18 = vmul.f32 %v1081_v21, %v712_v13 }
 0x1ef   : > { %1084 = vpow2.f32 %v703_v17  ;;  %v714_v25 = vmul.f32 %v1083_v22, %v710_v16 }
 0x1f0   : > { %1086 = vpow2.f32 %v699_v23  ;;  %v725_v31 = vsel %vm718_vm6, %v716_v18, 0.0 }
 0x1f1   : > { %726 = vadd.xlane.f32.xlu0 %v725_v31  ;;  %v719_v34 = vsel %vm718_vm6, %v714_v25, 0.0  ;;  %v747_v25 = vld [vmem:[#allocation2] sm:$0x1] }
 0x1f2   : > { %720 = vadd.xlane.f32.xlu2 %v719_v34 }
 0x1f5   : > { %v1085_v37 = vpop.eup %1084 }
 0x1f6   : > { %v1087_v41 = vpop.eup %1086  ;;  %v717_v43 = vmul.f32 %v1085_v37, %v713_v20 }
 0x1f7   : > { %v715_v44 = vmul.f32 %v1087_v41, %v711_v35 }
 0x1f8   : > { %v728_v45 = vsel %vm718_vm6, %v717_v43, 0.0 }
 0x1f9   : > { %729 = vadd.xlane.f32.xlu1 %v728_v45  ;;  %v722_v47 = vsel %vm718_vm6, %v715_v44, 0.0  ;;  %598 = vadd.xlane.f32.xlu0 %v597_v46 }
 0x1fa   : > { %723 = vadd.xlane.f32.xlu2 %v722_v47 }
 0x201   : > { %601 = vadd.xlane.f32.xlu1 %v600_v28 }
 0x202   : > { %595 = vadd.xlane.f32.xlu2 %v594_v50 }
 0x20a   : > { %604 = vadd.xlane.f32.xlu2 %v603_v53 }
 0x264   : > { %v727_v54 = vpop.xlane.xlu0 %726 }
 0x265   : > { %v721_v11 = vpop.xlane.xlu2 %720 }
 0x266   : > { %1088 = vlog2.f32 %v721_v11 }
 0x26c   : > { %v730_v55 = vpop.xlane.xlu1 %729  ;;  %v599_v56 = vpop.xlane.xlu0 %598 }
 0x26d   : > { %v724_v30 = vpop.xlane.xlu2 %723  ;;  %v1089_v12 = vpop.eup %1088  ;;  %v732_v61 = vmul.f32 10.0, %v599_v56 }
 0x26e   : > { %1090 = vlog2.f32 %v724_v30  ;;  %v736_v0 = vmul.f32 0.6931472, %v1089_v12 }
 0x26f   : > { %1092 = vlog2.f32 %v727_v54 }
 0x270   : > { %1094 = vlog2.f32 %v730_v55 }
 0x274   : > { %v1091_v57 = vpop.eup %1090  ;;  %v602_v32 = vpop.xlane.xlu1 %601 }
 0x275   : > { %v738_v60 = vmul.f32 0.6931472, %v1091_v57  ;;  %v596_v62 = vpop.xlane.xlu2 %595  ;;  %v1093_v2 = vpop.eup %1092  ;;  %v733_v3 = vmul.f32 10.0, %v602_v32 }
 0x276   : > { %v731_v1 = vmul.f32 10.0, %v596_v62  ;;  %v740_v42 = vmul.f32 0.6931472, %v1093_v2  ;;  %v1095_v7 = vpop.eup %1094 }
 0x277   : > { %v744_v39 = vsub.f32 %v732_v61, %v738_v60  ;;  %v742_v9 = vmul.f32 0.6931472, %v1095_v7 }
 0x278   : > { %v743_v63 = vsub.f32 %v731_v1, %v736_v0  ;;  %v745_v40 = vsub.f32 %v733_v3, %v740_v42 }
 0x279   : > { %v750_v6 = vsel %vm748_vm7, %v744_v39, 0.0 }
 0x27a   : > { %v749_v59 = vsel %vm748_vm7, %v743_v63, 0.0  ;;  %v752_v5 = vsel %vm748_vm7, %v745_v40, 0.0 }
 0x27b   : > { %v751_v4 = vadd.f32 %v750_v6, %v749_v59 }
 0x27d   : > { %v605_v8 = vpop.xlane.xlu2 %604  ;;  %v753_v14 = vadd.f32 %v752_v5, %v751_v4 }
 0x27e   : > { %v734_v58 = vmul.f32 10.0, %v605_v8 }
 0x280   : > { %v746_v13 = vsub.f32 %v734_v58, %v742_v9 }
 0x282   : > { %v754_v15 = vsel %vm748_vm7, %v746_v13, 0.0 }
 0x283   : > { %v755_v16 = vadd.f32 %v754_v15, %v753_v14 }
 0x285   : > { %756 = vadd.xlane.f32.xlu0 %v755_v16 }
 0x2f8   : > { %v757_v19 = vpop.xlane.xlu0 %756 }
 0x2f9   : > { %v758_v21 = vrot.slane %v757_v19, 4 }
 0x2fb   : > { %v759_v17 = vadd.f32 %v758_v21, %v757_v19 }
 0x2fd   : > { %v760_v22 = vrot.slane %v759_v17, 2 }
 0x2ff   : > { %v761_v23 = vadd.f32 %v760_v22, %v759_v17 }
 0x301   : > { %v762_v18 = vrot.slane %v761_v23, 1 }
 0x303   : > { %v763_v24 = vadd.f32 %v762_v18, %v761_v23 }
 0x305   : > { %1014 = vpush %v763_v24 }
 0x336   : > { %s1015_s27 = spop %1014  ;;  %772 = sbr.rel (%p954_p6) target bundleno = 1028 (0x404), region = 59 }
 0x337   : > { %v765_v26 = vstv %s1015_s27 }
 0x338   : > { %v766_v27 = vadd.f32 %v765_v26, %v747_v25 }
 0x33a   : > { %768 = vst.msk [vmem:[#allocation2] sm:$0x1] %vm767_vm8, %v766_v27 }
 0x33b   : > { %v776_v31 = vld [vmem:[%s1539_s3] sm:$0x3]  ;;  %vm781_vm9 = vcmask 25600  }
 0x33c   : > { %v777_v33 = vmax.f32 %v776_v31, 1e-30 }
 0x33e   : > { %1096 = vlog2.f32 %v777_v33 }
 0x341   : > { %v773_v37 = vld [vmem:[#allocation2] sm:$0x1] }
 0x342   : > { %v774_v38 = vsub.f32 0.0, %v773_v37 }
 0x344   : > { %v1097_v34 = vpop.eup %1096  ;;  %v775_v41 = vmul.f32 0.010416667, %v774_v38 }
 0x345   : > { %v779_v20 = vmul.f32 0.6931472, %v1097_v34 }
 0x346   : > { %797 = vst.msk [vmem:[#allocation7] sm:$0x1] %vm767_vm8, %v775_v41 }
 0x347   : > { %v780_v35 = vmul.f32 %v779_v20, %v776_v31 }
 0x349   : > { %v782_v36 = vsel %vm781_vm9, %v780_v35, 0.0 }
 0x34a   : > { %783 = vadd.xlane.f32.xlu0 %v782_v36 }
 0x3bd   : > { %v784_v43 = vpop.xlane.xlu0 %783 }
 0x3be   : > { %v785_v44 = vrot.slane %v784_v43, 4 }
 0x3c0   : > { %v786_v45 = vadd.f32 %v785_v44, %v784_v43 }
 0x3c2   : > { %v787_v46 = vrot.slane %v786_v45, 2 }
 0x3c4   : > { %v788_v29 = vadd.f32 %v787_v46, %v786_v45 }
 0x3c6   : > { %v789_v47 = vrot.slane %v788_v29, 1 }
 0x3c8   : > { %v790_v48 = vadd.f32 %v789_v47, %v788_v29 }
 0x3ca   : > { %1016 = vpush %v790_v48 }
 0x3fb   : > { %s1017_s30 = spop %1016 }
 0x3fc   : > { %v792_v10 = vstv %s1017_s30 }
 0x3fd   : > { %v793_v49 = vmul.f32 0.125, %v792_v10 }
 0x3ff   : > { %v794_v28 = vmul.f32 0.1, %v793_v49  ;;  %798 = vst.msk [vmem:[#allocation9] sm:$0x1] %vm767_vm8, %v793_v49 }
 0x401   : > { %v795_v50 = vadd.f32 %v794_v28, %v775_v41 }
 0x403   : > { %796 = vst.msk [vmem:[#allocation5] sm:$0x1] %vm767_vm8, %v795_v50 }
 0x404 PF: > { %p1030_p7 = scmp.eq.s32.totalorder %s1245_s22, 2  ;;  %s1201_s7 = smov [#allocation7]  }
 0x405   : > { %s817_s8 = sshll.u32 %s1201_s7, 4  ;;  %s819_s11 = sshll.u32 %s1541_s5, 4  ;;  %s818_s8 = int_to_ptr.vmem [resolvable:$true] %s817_s8  ;;  %s820_s11 = int_to_ptr.hbm [resolvable:$true] %s819_s11 }
 0x406   : > { %1021 = dma.vmem_to_hbm [thread:$0]  (%p1030_p7), %s818_s8, 16, %s820_s11, [#allocation8]  }
 0x407   : > { %s807_s14 = sshll.u32 %s1540_s4, 4  ;;  %s1202_s15 = smov [#allocation5]   ;;  %s808_s14 = int_to_ptr.hbm [resolvable:$true] %s807_s14 }
 0x408   : > { %s805_s16 = sshll.u32 %s1202_s15, 4  ;;  %s1203_s17 = smov [#allocation9]   ;;  %s806_s16 = int_to_ptr.vmem [resolvable:$true] %s805_s16 }
 0x409   : > { %1019 = dma.vmem_to_hbm [thread:$0]  (%p1030_p7), %s806_s16, 16, %s808_s14, [#allocation6]  }
 0x40a   : > { %s829_s18 = sshll.u32 %s1203_s17, 4  ;;  %s831_s23 = sshll.u32 %s1542_s6, 4  ;;  %s830_s18 = int_to_ptr.vmem [resolvable:$true] %s829_s18  ;;  %s832_s23 = int_to_ptr.hbm [resolvable:$true] %s831_s23 }
 0x40b   : > { %1023 = dma.vmem_to_hbm [thread:$0]  (%p1030_p7), %s830_s18, 16, %s832_s23, [#allocation8]  }
 0x40c   : > { %1189 = dma.done.wait (%p1030_p7), [#allocation6], 16  }
 0x40d   : > { %1191 = vsyncadd (%p1030_p7), [#allocation6], 4294967280 }
 0x40e   : > { %1193 = dma.done.wait (%p1030_p7), [#allocation8], 32  }
 0x40f   : > { %1195 = vsyncadd (%p1030_p7), [#allocation8], 4294967264 }
 0x410 PF: > { %s19_s21 = sadd.s32 1, %s1198_s21  }
 0x411   : > { %p16_p8 = scmp.ge.s32.totalorder %s19_s21, 5  }
 0x413   :  { %18 = sbr.rel (!%p16_p8) target bundleno = 2 (0x2), region = 110 }
 0x418   :  { %855 = vsyncpa [#allocation6], 1 }
 0x419   :  { %857 = vsyncpa [#allocation6 + $0x1], 1 }
 0x41a   :  { %858 = vsyncpa [#allocation8], 1 }
 0x41b   :  { %859 = vsyncmov [#allocation4] }
 0x41e   :  { %s860_s24 = vpop.sfrf %859 }
 0x41f   :  { %p963_p9 = scmp.ne.s32.totalorder %s860_s24, 0 }
 0x421   :  { %864 = shalt.err (%p963_p9)  }

</bundles_post_ra>
